<compile_context>
chip_gen: v5e
topology: v5e:2x2
jax: 0.10.0
libtpu: 0.0.40
codegen_flags: <defaults>
</compile_context>

<pallas_src>
import functools
import math

import jax
import jax.numpy as jnp
from jax import lax
from jax.experimental import pallas as pl
from jax.experimental.pallas import tpu as pltpu


# ----------------------------------------------------------------------------
# Toy-sized deterministic configuration (mirrors Feature_Extraction_Layer
# __init__, scaled down: sample_rate / n_fft / hop / n_mels / n_mfcc / bins).
# ----------------------------------------------------------------------------
SAMPLE_RATE = 1000
N_FFT = 64                  # int(window_length * sample_rate)
WIN_LENGTH = 64
HOP_LENGTH = 16             # int(hop_length * sample_rate)
SIGNAL_LEN = 256
BATCH = 2

N_MELS_MELSPEC = 12         # module uses 44
N_MELS_MFCC = 16            # module uses 48 (internal mel bank of MFCC branch)
N_MFCC = 8                  # module uses 16
STFT_FREQ_BINS = 16         # module uses 48

OUT_LANES = 128             # lane-dense output slab width

# Final output lane layout of the fused kernel (also used by the wrapper).
MEL_C0 = 0                                  # lanes  0..11 : mel spectrogram
MFCC_C0 = N_MELS_MELSPEC                    # lanes 12..19 : MFCC
STFT_C0 = N_MELS_MELSPEC + N_MFCC           # lanes 20..35 : STFT magnitude
MFCC_MEL_C0 = 36                            # lanes 36..51 : MFCC mel scratch (pre-DCT)

INPUT_FEATURES = ("Mel_Spectrogram", "MFCC", "STFT")
# TODO(synk): GFCC / CQT / VQT branches (nnAudio gammatone / constant-Q kernel
# generation) are not implemented; they are simply not selected in
# INPUT_FEATURES, just as the reference forward() skips unselected features.
# TODO(synk): Adaptive_Pad_Layer source is not provided; we assume zero-padding
# on the bottom/right of every feature map up to a common (H, W) so the stack
# on dim=1 is well formed.
# TODO(synk): framing is still an XLA gather in the wrapper; at production
# sample rates it could be moved in-kernel via pl.ds strided reads of a
# VMEM-resident signal (negligible at this toy size).


def _round_up(x, m):
    return ((x + m - 1) // m) * m


# ----------------------------------------------------------------------------
# Deterministic parameter construction (windowed Fourier basis, combined
# filterbank/selector matrix, embedded DCT matrix) — plain JAX, no checkpoints.
# ----------------------------------------------------------------------------
def hann_window(n):
    k = jnp.arange(n, dtype=jnp.float32)
    return 0.5 - 0.5 * jnp.cos(2.0 * math.pi * k / n)


def fourier_basis(n_fft, freq_bins):
    # cos/sin basis, shape (n_fft, freq_bins)
    n = jnp.arange(n_fft, dtype=jnp.float32)[:, None]
    f = jnp.arange(freq_bins, dtype=jnp.float32)[None, :]
    ang = 2.0 * math.pi * n * f / n_fft
    return jnp.cos(ang), jnp.sin(ang)


def mel_filterbank(n_mels, n_fft, sr):
    # librosa-style triangular mel filters (no norm), shape (n_fft//2+1, n_mels)
    def hz_to_mel(f):
        return 2595.0 * jnp.log10(1.0 + f / 700.0)

    def mel_to_hz(m):
        return 700.0 * (10.0 ** (m / 2595.0) - 1.0)

    n_bins = n_fft // 2 + 1
    fftfreqs = jnp.linspace(0.0, sr / 2.0, n_bins)
    mel_pts = jnp.linspace(hz_to_mel(jnp.float32(0.0)),
                           hz_to_mel(jnp.float32(sr / 2.0)), n_mels + 2)
    hz_pts = mel_to_hz(mel_pts)
    fdiff = hz_pts[1:] - hz_pts[:-1]
    ramps = hz_pts[:, None] - fftfreqs[None, :]
    lower = -ramps[:-2] / fdiff[:-1, None]
    upper = ramps[2:] / fdiff[1:, None]
    fb = jnp.maximum(0.0, jnp.minimum(lower, upper))   # (n_mels, n_bins)
    return fb.T.astype(jnp.float32)                    # (n_bins, n_mels)


def dct_matrix(n_in, n_out):
    # DCT-II with ortho norm, applied as (T, n_in) @ (n_in, n_out)
    n = jnp.arange(n_in, dtype=jnp.float32)[:, None]
    k = jnp.arange(n_out, dtype=jnp.float32)[None, :]
    mat = jnp.cos(math.pi / n_in * (n + 0.5) * k)
    scale = jnp.where(k == 0, math.sqrt(1.0 / n_in), math.sqrt(2.0 / n_in))
    return (mat * scale).astype(jnp.float32)           # (n_in, n_out)


def build_params():
    n_bins = N_FFT // 2 + 1                            # 33

    # --- windowed Fourier basis: [cos | pad | sin | pad] -> (n_fft, 128) bf16.
    cos_full, sin_full = fourier_basis(N_FFT, n_bins)  # (64, 33) each
    cos_p = jnp.pad(cos_full, ((0, 0), (0, N_FFT - n_bins)))
    sin_p = jnp.pad(sin_full, ((0, 0), (0, N_FFT - n_bins)))
    basis = jnp.concatenate([cos_p, sin_p], axis=1)    # (64, 128)
    wbasis = (hann_window(WIN_LENGTH)[:, None] * basis).astype(jnp.bfloat16)

    # --- combo matrix: power = spec_cos^2 + spec_sin^2 folded in via row
    # duplication; columns place each branch at its final output lane.
    fb_melspec = mel_filterbank(N_MELS_MELSPEC, N_FFT, SAMPLE_RATE)  # (33, 12)
    fb_mfcc = mel_filterbank(N_MELS_MFCC, N_FFT, SAMPLE_RATE)        # (33, 16)

    half = jnp.zeros((N_FFT, OUT_LANES), jnp.float32)
    half = half.at[:n_bins, MEL_C0:MEL_C0 + N_MELS_MELSPEC].set(fb_melspec)
    half = half.at[:n_bins, MFCC_MEL_C0:MFCC_MEL_C0 + N_MELS_MFCC].set(fb_mfcc)
    half = half.at[:STFT_FREQ_BINS, STFT_C0:STFT_C0 + STFT_FREQ_BINS].set(
        jnp.eye(STFT_FREQ_BINS, dtype=jnp.float32))
    combo = jnp.concatenate([half, half], axis=0)      # (128, 128)

    # --- DCT-II (ortho) embedded: scratch lanes 36..51 -> output lanes 12..19.
    dctm = dct_matrix(N_MELS_MFCC, N_MFCC)             # (16, 8)
    dct_embed = jnp.zeros((OUT_LANES, OUT_LANES), jnp.float32)
    dct_embed = dct_embed.at[MFCC_MEL_C0:MFCC_MEL_C0 + N_MELS_MFCC,
                             MFCC_C0:MFCC_C0 + N_MFCC].set(dctm)

    return dict(wbasis=wbasis, combo=combo, dct_embed=dct_embed)


# ----------------------------------------------------------------------------
# Fused Pallas kernel: windowed-Fourier matmul -> square -> combo matmul
# (mel fbs + STFT bin select) -> per-branch elementwise (sqrt / dB) ->
# embedded-DCT matmul -> lane-dense output slab.
# ----------------------------------------------------------------------------
def _fused_kernel(frames_ref, wbasis_ref, combo_ref, dct_ref, o_ref,
                  *, t_valid_mfcc):
    two, B, Tp, nfft = frames_ref.shape                 # (2, B, Tp, 64); static
    R = two * B * Tp

    # MXU matmul #1: windowed Fourier projection (Hann folded into the basis).
    frames = frames_ref[...].reshape(R, nfft).astype(jnp.bfloat16)
    spec = jnp.dot(frames, wbasis_ref[...],
                   preferred_element_type=jnp.float32)   # (R, 128)
    sq = spec * spec                                     # VPU, full vregs

    # MXU matmul #2: re^2+im^2 + both mel filterbanks + STFT bin selection,
    # all in one (128,128) operand; results land at final output lanes.
    feat = jnp.dot(sq, combo_ref[...],
                   preferred_element_type=jnp.float32)   # (R, 128)
    feat = feat.reshape(two, B, Tp, OUT_LANES)
    feat_c = feat[0]                                     # centered: Mel, STFT
    feat_nc = feat[1]                                    # non-centered: MFCC

    lane = lax.broadcasted_iota(jnp.int32, (B, Tp, OUT_LANES), 2)
    tpos = lax.broadcasted_iota(jnp.int32, (B, Tp, OUT_LANES), 1)

    # Centered-frame branches, assembled with lane masks (no lane movement).
    mel_mask = lane < N_MELS_MELSPEC
    stft_mask = (lane >= STFT_C0) & (lane < STFT_C0 + STFT_FREQ_BINS)
    out_c = (jnp.where(mel_mask, feat_c, 0.0)
             + jnp.where(stft_mask, jnp.sqrt(jnp.maximum(feat_c, 0.0)), 0.0))

    # MFCC branch: power -> dB (top_db = 80, per-batch reference max) -> DCT.
    db = 10.0 * jnp.log10(jnp.maximum(feat_nc, 1e-10))   # EUP
    mfcc_mask = (lane >= MFCC_MEL_C0) & (lane < MFCC_MEL_C0 + N_MELS_MFCC)
    valid = mfcc_mask & (tpos < t_valid_mfcc)            # ignore padded frames
    db_masked = jnp.where(valid, db, -jnp.inf)
    db_max = jnp.max(db_masked, axis=2, keepdims=True)
    db_max = jnp.max(db_max, axis=1, keepdims=True)      # per-batch max
    db = jnp.maximum(db, db_max - 80.0)
    # Embedded DCT: only rows 36..51 / cols 12..19 are nonzero, so the other
    # (finite) lanes of db contribute nothing.
    mfcc = jnp.dot(db.reshape(B * Tp, OUT_LANES), dct_ref[...],
                   preferred_element_type=jnp.float32)
    mfcc = mfcc.reshape(B, Tp, OUT_LANES)

    # Lane-dense output slab: [mel 12 | mfcc 8 | stft 16 | zeros].
    o_ref[...] = out_c + mfcc


def fused_features_pallas(frames, wbasis, combo, dct_embed, t_valid_mfcc):
    two, B, Tp, nfft = frames.shape
    kernel = functools.partial(_fused_kernel, t_valid_mfcc=t_valid_mfcc)
    return pl.pallas_call(
        kernel,
        out_shape=jax.ShapeDtypeStruct((B, Tp, OUT_LANES), jnp.float32),
        grid=(1,),
        in_specs=[
            pl.BlockSpec((two, B, Tp, nfft), lambda i: (0, 0, 0, 0)),
            pl.BlockSpec(wbasis.shape, lambda i: (0, 0)),
            pl.BlockSpec(combo.shape, lambda i: (0, 0)),
            pl.BlockSpec(dct_embed.shape, lambda i: (0, 0)),
        ],
        out_specs=pl.BlockSpec((B, Tp, OUT_LANES), lambda i: (0, 0, 0)),
        compiler_params=pltpu.CompilerParams(
            dimension_semantics=("arbitrary",)),
    )(frames, wbasis, combo, dct_embed)


# ----------------------------------------------------------------------------
# Glue: framing, padding, stacking (matches torch ZeroPad2d / stack semantics).
# ----------------------------------------------------------------------------
def frame_signal(x, n_fft, hop, center):
    if center:
        x = jnp.pad(x, ((0, 0), (n_fft // 2, n_fft // 2)), mode="reflect")
    L = x.shape[-1]
    T = 1 + (L - n_fft) // hop
    idx = jnp.arange(T)[:, None] * hop + jnp.arange(n_fft)[None, :]
    return x[:, idx]                                   # (B, T, n_fft)


def zero_pad2d(x, left, right, top, bottom):
    # x: (B, H, W), same convention as torch.nn.ZeroPad2d((left,right,top,bottom))
    return jnp.pad(x, ((0, 0), (top, bottom), (left, right)))


def adaptive_pad(x, H, W):
    b, h, w = x.shape
    return jnp.pad(x, ((0, 0), (0, H - h), (0, W - w)))


def feature_extraction_forward(x, p):
    # Build both frame sets once; centered frames are shared by Mel + STFT.
    frames_c = frame_signal(x, N_FFT, HOP_LENGTH, center=True)    # (B, Tc, 64)
    frames_nc = frame_signal(x, N_FFT, HOP_LENGTH, center=False)  # (B, Tnc, 64)
    Tc, Tnc = frames_c.shape[1], frames_nc.shape[1]
    Tp = _round_up(max(Tc, Tnc), 8)                   # sublane-aligned time axis

    fc = jnp.pad(frames_c, ((0, 0), (0, Tp - Tc), (0, 0)))
    fnc = jnp.pad(frames_nc, ((0, 0), (0, Tp - Tnc), (0, 0)))
    frames = jnp.stack([fc, fnc], axis=0)             # (2, B, Tp, 64)

    slab = fused_features_pallas(frames, p["wbasis"], p["combo"],
                                 p["dct_embed"], Tnc)  # (B, Tp, 128)

    feats = []
    for name in INPUT_FEATURES:
        if name == "Mel_Spectrogram":
            f = jnp.transpose(slab[:, :Tc, MEL_C0:MEL_C0 + N_MELS_MELSPEC],
                              (0, 2, 1))
            f = zero_pad2d(f, 1, 4, 0, 4)              # ZeroPad2d((1,4,0,4))
        elif name == "MFCC":
            f = jnp.transpose(slab[:, :Tnc, MFCC_C0:MFCC_C0 + N_MFCC],
                              (0, 2, 1))
            f = zero_pad2d(f, 1, 0, 4, 0)              # ZeroPad2d((1,0,4,0))
        elif name == "STFT":
            f = jnp.transpose(slab[:, :Tc, STFT_C0:STFT_C0 + STFT_FREQ_BINS],
                              (0, 2, 1))
            f = zero_pad2d(f, 1, 0, 0, 0)              # ZeroPad2d((1,0,0,0))
        else:
            raise ValueError(name)
        feats.append(f)

    H = max(int(f.shape[1]) for f in feats)
    W = max(int(f.shape[2]) for f in feats)
    feats = [adaptive_pad(f, H, W) for f in feats]
    return jnp.stack(feats, axis=1)                    # (B, num_features, H, W)


if __name__ == "__main__":
    key = jax.random.PRNGKey(0)
    x = jax.random.normal(key, (BATCH, SIGNAL_LEN), dtype=jnp.float32)

    params = build_params()
    forward = jax.jit(feature_extraction_forward)
    out = forward(x, params)
    out = jax.block_until_ready(out)

    assert out.ndim == 4 and out.shape[0] == BATCH and out.shape[1] == len(INPUT_FEATURES)
    assert bool(jnp.all(jnp.isfinite(out)))
    print("KERNEL_OK")
</pallas_src>

<mosaic_0001>
module attributes {stable_mosaic.version = 11 : i64} {
  func.func @_fused_kernel(%arg0: i32, %arg1: memref<2x2x24x64xf32, #tpu.memory_space<vmem>>, %arg2: memref<64x128xbf16, #tpu.memory_space<vmem>>, %arg3: memref<128x128xf32, #tpu.memory_space<vmem>>, %arg4: memref<128x128xf32, #tpu.memory_space<vmem>>, %arg5: memref<2x24x128xf32, #tpu.memory_space<vmem>>) attributes {dimension_semantics = [#tpu.dimension_semantics<arbitrary>], iteration_bounds = array<i64: 1>, scalar_prefetch = 0 : i64, scratch_operands = 0 : i64, tpu.core_type = #tpu.core_type<tc>, window_params = [{pipeline_mode = #tpu.pipeline_mode<synchronous>, transform_indices = @transform_0, window_bounds = array<i64: 2, 2, 24, 64>}, {pipeline_mode = #tpu.pipeline_mode<synchronous>, transform_indices = @transform_1, window_bounds = array<i64: 64, 128>}, {pipeline_mode = #tpu.pipeline_mode<synchronous>, transform_indices = @transform_2, window_bounds = array<i64: 128, 128>}, {pipeline_mode = #tpu.pipeline_mode<synchronous>, transform_indices = @transform_3, window_bounds = array<i64: 128, 128>}, {pipeline_mode = #tpu.pipeline_mode<synchronous>, transform_indices = @transform_4, window_bounds = array<i64: 2, 24, 128>}]} {
    %c0 = arith.constant 0 : index
    %c0_0 = arith.constant 0 : index
    %c0_1 = arith.constant 0 : index
    %c0_2 = arith.constant 0 : index
    %0 = vector.load %arg1[%c0, %c0_0, %c0_1, %c0_2] : memref<2x2x24x64xf32, #tpu.memory_space<vmem>>, vector<2x2x24x64xf32>
    %1 = vector.shape_cast %0 : vector<2x2x24x64xf32> to vector<96x64xf32>
    %2 = arith.truncf %1 : vector<96x64xf32> to vector<96x64xbf16>
    %c0_3 = arith.constant 0 : index
    %c0_4 = arith.constant 0 : index
    %3 = vector.load %arg2[%c0_3, %c0_4] : memref<64x128xbf16, #tpu.memory_space<vmem>>, vector<64x128xbf16>
    %cst = arith.constant dense<0.000000e+00> : vector<96x128xf32>
    %4 = tpu.matmul %2, %3, %cst {dimension_numbers = #tpu.dot_dimension_numbers<[1], [0], [0], [1], [0, 0, 1, 1], [], []>} : vector<96x64xbf16>, vector<64x128xbf16>, vector<96x128xf32> -> vector<96x128xf32>
    %5 = arith.mulf %4, %4 : vector<96x128xf32>
    %c0_5 = arith.constant 0 : index
    %c0_6 = arith.constant 0 : index
    %6 = vector.load %arg3[%c0_5, %c0_6] : memref<128x128xf32, #tpu.memory_space<vmem>>, vector<128x128xf32>
    %cst_7 = arith.constant dense<0.000000e+00> : vector<96x128xf32>
    %7 = tpu.matmul %5, %6, %cst_7 {dimension_numbers = #tpu.dot_dimension_numbers<[1], [0], [0], [1], [0, 0, 1, 1], [], []>} : vector<96x128xf32>, vector<128x128xf32>, vector<96x128xf32> -> vector<96x128xf32>
    %8 = vector.shape_cast %7 : vector<96x128xf32> to vector<2x2x24x128xf32>
    %9 = vector.extract_strided_slice %8 {offsets = [0, 0, 0, 0], sizes = [1, 2, 24, 128], strides = [1, 1, 1, 1]} : vector<2x2x24x128xf32> to vector<1x2x24x128xf32>
    %10 = vector.shape_cast %9 : vector<1x2x24x128xf32> to vector<2x24x128xf32>
    %11 = vector.extract_strided_slice %8 {offsets = [1, 0, 0, 0], sizes = [1, 2, 24, 128], strides = [1, 1, 1, 1]} : vector<2x2x24x128xf32> to vector<1x2x24x128xf32>
    %12 = vector.shape_cast %11 : vector<1x2x24x128xf32> to vector<2x24x128xf32>
    %13 = tpu.iota {dimensions = array<i32: 2>} : vector<2x24x128xi32>
    %14 = tpu.iota {dimensions = array<i32: 1>} : vector<2x24x128xi32>
    %c12_i32 = arith.constant 12 : i32
    %15 = vector.broadcast %c12_i32 : i32 to vector<2x24x128xi32>
    %16 = arith.cmpi slt, %13, %15 : vector<2x24x128xi32>
    %c20_i32 = arith.constant 20 : i32
    %17 = vector.broadcast %c20_i32 : i32 to vector<2x24x128xi32>
    %18 = arith.cmpi sge, %13, %17 : vector<2x24x128xi32>
    %c36_i32 = arith.constant 36 : i32
    %19 = vector.broadcast %c36_i32 : i32 to vector<2x24x128xi32>
    %20 = arith.cmpi slt, %13, %19 : vector<2x24x128xi32>
    %21 = arith.andi %18, %20 : vector<2x24x128xi1>
    %cst_8 = arith.constant 0.000000e+00 : f32
    %22 = vector.broadcast %cst_8 : f32 to vector<2x24x128xf32>
    %23 = arith.select %16, %10, %22 : vector<2x24x128xi1>, vector<2x24x128xf32>
    %cst_9 = arith.constant 0.000000e+00 : f32
    %24 = vector.broadcast %cst_9 : f32 to vector<2x24x128xf32>
    %25 = arith.maximumf %10, %24 : vector<2x24x128xf32>
    %26 = math.sqrt %25 : vector<2x24x128xf32>
    %cst_10 = arith.constant 0.000000e+00 : f32
    %27 = vector.broadcast %cst_10 : f32 to vector<2x24x128xf32>
    %28 = arith.select %21, %26, %27 : vector<2x24x128xi1>, vector<2x24x128xf32>
    %29 = arith.addf %23, %28 : vector<2x24x128xf32>
    %cst_11 = arith.constant 1.000000e-10 : f32
    %30 = vector.broadcast %cst_11 : f32 to vector<2x24x128xf32>
    %31 = arith.maximumf %12, %30 : vector<2x24x128xf32>
    %32 = math.log %31 : vector<2x24x128xf32>
    %cst_12 = arith.constant 0.434294492 : f32
    %33 = vector.broadcast %cst_12 : f32 to vector<2x24x128xf32>
    %34 = arith.mulf %32, %33 : vector<2x24x128xf32>
    %cst_13 = arith.constant 1.000000e+01 : f32
    %35 = vector.broadcast %cst_13 : f32 to vector<2x24x128xf32>
    %36 = arith.mulf %35, %34 : vector<2x24x128xf32>
    %c36_i32_14 = arith.constant 36 : i32
    %37 = vector.broadcast %c36_i32_14 : i32 to vector<2x24x128xi32>
    %38 = arith.cmpi sge, %13, %37 : vector<2x24x128xi32>
    %c52_i32 = arith.constant 52 : i32
    %39 = vector.broadcast %c52_i32 : i32 to vector<2x24x128xi32>
    %40 = arith.cmpi slt, %13, %39 : vector<2x24x128xi32>
    %41 = arith.andi %38, %40 : vector<2x24x128xi1>
    %c13_i32 = arith.constant 13 : i32
    %42 = vector.broadcast %c13_i32 : i32 to vector<2x24x128xi32>
    %43 = arith.cmpi slt, %14, %42 : vector<2x24x128xi32>
    %44 = arith.andi %41, %43 : vector<2x24x128xi1>
    %cst_15 = arith.constant 0xFF800000 : f32
    %45 = vector.broadcast %cst_15 : f32 to vector<2x24x128xf32>
    %46 = arith.select %44, %36, %45 : vector<2x24x128xi1>, vector<2x24x128xf32>
    %cst_16 = arith.constant dense<0xFF800000> : vector<2x24xf32>
    %47 = vector.multi_reduction <maximumf>, %46, %cst_16 [2] : vector<2x24x128xf32> to vector<2x24xf32>
    %48 = vector.shape_cast %47 : vector<2x24xf32> to vector<2x24x1xf32>
    %cst_17 = arith.constant dense<0xFF800000> : vector<2x1xf32>
    %49 = vector.multi_reduction <maximumf>, %48, %cst_17 [1] : vector<2x24x1xf32> to vector<2x1xf32>
    %50 = vector.shape_cast %49 : vector<2x1xf32> to vector<2x1x1xf32>
    %cst_18 = arith.constant 8.000000e+01 : f32
    %51 = vector.broadcast %cst_18 : f32 to vector<2x1x1xf32>
    %52 = arith.subf %50, %51 : vector<2x1x1xf32>
    %53 = vector.broadcast %52 : vector<2x1x1xf32> to vector<2x24x128xf32>
    %54 = arith.maximumf %36, %53 : vector<2x24x128xf32>
    %55 = vector.shape_cast %54 : vector<2x24x128xf32> to vector<48x128xf32>
    %c0_19 = arith.constant 0 : index
    %c0_20 = arith.constant 0 : index
    %56 = vector.load %arg4[%c0_19, %c0_20] : memref<128x128xf32, #tpu.memory_space<vmem>>, vector<128x128xf32>
    %cst_21 = arith.constant dense<0.000000e+00> : vector<48x128xf32>
    %57 = tpu.matmul %55, %56, %cst_21 {dimension_numbers = #tpu.dot_dimension_numbers<[1], [0], [0], [1], [0, 0, 1, 1], [], []>} : vector<48x128xf32>, vector<128x128xf32>, vector<48x128xf32> -> vector<48x128xf32>
    %58 = vector.shape_cast %57 : vector<48x128xf32> to vector<2x24x128xf32>
    %59 = arith.addf %29, %58 : vector<2x24x128xf32>
    %c0_22 = arith.constant 0 : index
    %c0_23 = arith.constant 0 : index
    %c0_24 = arith.constant 0 : index
    %60 = vector.load %arg5[%c0_22, %c0_23, %c0_24] : memref<2x24x128xf32, #tpu.memory_space<vmem>>, vector<2x24x128xf32>
    tpu.vector_store %arg5[%c0_22, %c0_23, %c0_24], %59 {strides = array<i32>} : memref<2x24x128xf32, #tpu.memory_space<vmem>>, vector<2x24x128xf32>,
    return
  }
  func.func @transform_0(%arg0: i32) -> (i32, i32, i32, i32) {
    %c0_i32 = arith.constant 0 : i32
    %c0_i32_0 = arith.constant 0 : i32
    %c0_i32_1 = arith.constant 0 : i32
    %c0_i32_2 = arith.constant 0 : i32
    %c0_i32_3 = arith.constant 0 : i32
    return %c0_i32, %c0_i32_0, %c0_i32_1, %c0_i32_2 : i32, i32, i32, i32
  }
  func.func @transform_1(%arg0: i32) -> (i32, i32) {
    %c0_i32 = arith.constant 0 : i32
    %c0_i32_0 = arith.constant 0 : i32
    %c0_i32_1 = arith.constant 0 : i32
    return %c0_i32, %c0_i32_0 : i32, i32
  }
  func.func @transform_2(%arg0: i32) -> (i32, i32) {
    %c0_i32 = arith.constant 0 : i32
    %c0_i32_0 = arith.constant 0 : i32
    %c0_i32_1 = arith.constant 0 : i32
    return %c0_i32, %c0_i32_0 : i32, i32
  }
  func.func @transform_3(%arg0: i32) -> (i32, i32) {
    %c0_i32 = arith.constant 0 : i32
    %c0_i32_0 = arith.constant 0 : i32
    %c0_i32_1 = arith.constant 0 : i32
    return %c0_i32, %c0_i32_0 : i32, i32
  }
  func.func @transform_4(%arg0: i32) -> (i32, i32, i32) {
    %c0_i32 = arith.constant 0 : i32
    %c0_i32_0 = arith.constant 0 : i32
    %c0_i32_1 = arith.constant 0 : i32
    %c0_i32_2 = arith.constant 0 : i32
    return %c0_i32, %c0_i32_0, %c0_i32_1 : i32, i32, i32
  }
}

</mosaic_0001>

<bundles_post_ra>
// kernel: feature_extraction_forward.1
= control target key start
LH: loop header
LB: loop body
LE: loop exit
PB: predicated region body
PF: predicated region fallthrough
CT: control target
= control target key end

     0   :  { %vm68_vm0 = vcmask 523264   ;;  %v207_v62 = vlaneseq  ;;  %s816_s1 = inlined_call_operand.vmem [shape: bf16[64,128], index: 1, kind: input, shape index: {}]   ;;  %s817_s0 = inlined_call_operand.vmem [shape: f32[2,2,24,64], index: 0, kind: input, shape index: {}]   ;;  %s818_s2 = inlined_call_operand.vmem [shape: f32[128,128], index: 2, kind: input, shape index: {}]   ;;  %s819_s3 = inlined_call_operand.vmem [shape: f32[128,128], index: 3, kind: input, shape index: {}]   ;;  %s820_s4 = inlined_call_operand.vmem [shape: f32[2,24,128], index: 4, kind: output, shape index: {}]  }
   0x1   :  { %v488_v0 = vld [vmem:[%s816_s1 + $0x18] sm:$0xff]  ;;  %v487_v1 = vld [vmem:[%s816_s1 + $0x10] sm:$0xff]  ;;  %v486_v2 = vld [vmem:[%s816_s1 + $0x8] sm:$0xff] }
   0x2   :  { %91 = vmatpush.bf16.msra.mxu0 %v488_v0  ;;  %v485_v3 = vld [vmem:[%s816_s1] sm:$0xff]  ;;  %v19_v5 = vld [vmem:[%s817_s0 + $0x8] sm:$0xff]  ;;  %v20_v7 = vld [vmem:[%s817_s0 + $0x10] sm:$0xff]  ;;  %v659_v63 = vand.u32 127, %v207_v62 }
   0x3   :  { %v18_v4 = vld [vmem:[%s817_s0] sm:$0xff]  ;;  %v21_v8 = vld [vmem:[%s817_s0 + $0x18] sm:$0xff]  ;;  %v23_v11 = vld [vmem:[%s817_s0 + $0x28] sm:$0xff] }
   0x4   :  { %v30_v6 = vpack.c.bf16 %v19_v5, %v18_v4  ;;  %v31_v9 = vpack.c.bf16 %v21_v8, %v20_v7  ;;  %v22_v10 = vld [vmem:[%s817_s0 + $0x20] sm:$0xff]  ;;  %v24_v13 = vld [vmem:[%s817_s0 + $0x30] sm:$0xff]  ;;  %v25_v14 = vld [vmem:[%s817_s0 + $0x38] sm:$0xff]  ;;  %vm213_vm1 = vcmp.lt.s32.totalorder %v659_v63, 12  ;;  %vm214_vm2 = vcmp.ge.s32.totalorder %v659_v63, 20 }
   0x5   :  { %v32_v12 = vpack.c.bf16 %v23_v11, %v22_v10  ;;  %v33_v15 = vpack.c.bf16 %v25_v14, %v24_v13  ;;  %v153_v16 = vld [vmem:[%s818_s2 + $0x78] sm:$0xff]  ;;  %v152_v17 = vld [vmem:[%s818_s2 + $0x70] sm:$0xff]  ;;  %v151_v18 = vld [vmem:[%s818_s2 + $0x68] sm:$0xff]  ;;  %vm215_vm3 = vcmp.lt.s32.totalorder %v659_v63, 36  ;;  %vm343_vm15 = vcmp.ge.s32.totalorder %v659_v63, 36 }
   0x6   :  { %92 = vmatpush.bf16.msra.mxu0 %v487_v1  ;;  %154 = vmatpush.msra.mxu1 %v153_v16  ;;  %v150_v19 = vld [vmem:[%s818_s2 + $0x60] sm:$0xff]  ;;  %v149_v20 = vld [vmem:[%s818_s2 + $0x58] sm:$0xff]  ;;  %v148_v21 = vld [vmem:[%s818_s2 + $0x50] sm:$0xff] }
   0x7   :  { %489 = vmatpush.msra.mxu3 %v153_v16  ;;  %v26_v22 = vld [vmem:[%s817_s0 + $0x40] sm:$0xff]  ;;  %v27_v23 = vld [vmem:[%s817_s0 + $0x48] sm:$0xff]  ;;  %v145_v27 = vld [vmem:[%s818_s2 + $0x38] sm:$0xff] }
   0x8   :  { %155 = vmatpush.msra.mxu1 %v152_v17  ;;  %v147_v24 = vld [vmem:[%s818_s2 + $0x48] sm:$0xff]  ;;  %v34_v25 = vpack.c.bf16 %v27_v23, %v26_v22  ;;  %v146_v26 = vld [vmem:[%s818_s2 + $0x40] sm:$0xff]  ;;  %v144_v28 = vld [vmem:[%s818_s2 + $0x30] sm:$0xff] }
   0x9   :  { %490 = vmatpush.msra.mxu3 %v152_v17  ;;  %v143_v29 = vld [vmem:[%s818_s2 + $0x28] sm:$0xff]  ;;  %v142_v30 = vld [vmem:[%s818_s2 + $0x20] sm:$0xff]  ;;  %v141_v31 = vld [vmem:[%s818_s2 + $0x18] sm:$0xff] }
   0xa   :  { %93 = vmatpush.bf16.msra.mxu0 %v486_v2  ;;  %156 = vmatpush.msra.mxu1 %v151_v18  ;;  %v140_v32 = vld [vmem:[%s818_s2 + $0x10] sm:$0xff]  ;;  %v29_v34 = vld [vmem:[%s817_s0 + $0x58] sm:$0xff]  ;;  %v139_v36 = vld [vmem:[%s818_s2 + $0x8] sm:$0xff] }
   0xb   :  { %491 = vmatpush.msra.mxu3 %v151_v18  ;;  %v28_v33 = vld [vmem:[%s817_s0 + $0x50] sm:$0xff]  ;;  %v138_v37 = vld [vmem:[%s818_s2] sm:$0xff]  ;;  %vm670_vm4 = vmand %vm214_vm2, %vm215_vm3 }
   0xc   :  { %157 = vmatpush.msra.mxu1 %v150_v19  ;;  %v35_v35 = vpack.c.bf16 %v29_v34, %v28_v33 }
   0xd   :  { %492 = vmatpush.msra.mxu3 %v150_v19 }
   0xe   :  { %94 = vmatpush.bf16.msra.mxu0 %v485_v3  ;;  %158 = vmatpush.msra.mxu1 %v149_v20 }
   0xf   :  { %493 = vmatpush.msra.mxu3 %v149_v20 }
  0x10   :  { %159 = vmatpush.msra.mxu1 %v148_v21 }
  0x11   :  { %477 = vmatmul.msk.bf16.vlgmr.msra.gmra.mxu0 %vm68_vm0, %v30_v6  ;;  %494 = vmatpush.msra.mxu3 %v148_v21 }
  0x12   :  { %160 = vmatpush.msra.mxu1 %v147_v24 }
  0x13   :  { %495 = vmatpush.msra.mxu3 %v147_v24 }
  0x14   :  { %161 = vmatpush.msra.mxu1 %v146_v26 }
  0x15   :  { %496 = vmatpush.msra.mxu3 %v146_v26 }
  0x16   :  { %162 = vmatpush.msra.mxu1 %v145_v27 }
  0x17   :  { %497 = vmatpush.msra.mxu3 %v145_v27 }
  0x18   :  { %163 = vmatpush.msra.mxu1 %v144_v28 }
  0x19   :  { %498 = vmatpush.msra.mxu3 %v144_v28 }
  0x1a   :  { %164 = vmatpush.msra.mxu1 %v143_v29 }
  0x1b   :  { %499 = vmatpush.msra.mxu3 %v143_v29 }
  0x1c   :  { %165 = vmatpush.msra.mxu1 %v142_v30 }
  0x1d   :  { %500 = vmatpush.msra.mxu3 %v142_v30 }
  0x1e   :  { %166 = vmatpush.msra.mxu1 %v141_v31 }
  0x1f   :  { %501 = vmatpush.msra.mxu3 %v141_v31 }
  0x20   :  { %167 = vmatpush.msra.mxu1 %v140_v32 }
  0x21   :  { %478 = vmatmul.msk.bf16.gmra.mxu0 %vm68_vm0, %v31_v9  ;;  %502 = vmatpush.msra.mxu3 %v140_v32 }
  0x22   :  { %168 = vmatpush.msra.mxu1 %v139_v36 }
  0x23   :  { %503 = vmatpush.msra.mxu3 %v139_v36 }
  0x24   :  { %169 = vmatpush.msra.mxu1 %v138_v37 }
  0x25   :  { %504 = vmatpush.msra.mxu3 %v138_v37 }
  0x31   :  { %479 = vmatmul.msk.bf16.gmra.mxu0 %vm68_vm0, %v32_v12 }
  0x41   :  { %480 = vmatmul.msk.bf16.gmra.mxu0 %vm68_vm0, %v33_v15 }
  0x51   :  { %481 = vmatmul.msk.bf16.gmra.mxu0 %vm68_vm0, %v34_v25 }
  0x61   :  { %482 = vmatmul.msk.bf16.gmra.mxu0 %vm68_vm0, %v35_v35  ;;  %vm344_vm0 = vcmp.lt.s32.totalorder %v659_v63, 52 }
  0x8e   :  { %v96_v38 = vpop.f32.mrf.mxu0 }
  0x8f   :  { %v126_v39 = vmul.f32 %v96_v38, %v96_v38 }
  0x91   :  { %170 = vmatmul.f32.vlgmr.msra.gmra.mxu1 %v126_v39 }
  0x96   :  { %v98_v40 = vpop.f32.mrf.mxu0 }
  0x97   :  { %v127_v41 = vmul.f32 %v98_v40, %v98_v40 }
  0x99   :  { %173 = vmatmul.f32.gmra.mxu1 %v127_v41 }
  0x9e   :  { %v101_v42 = vpop.f32.mrf.mxu0 }
  0x9f   :  { %v128_v43 = vmul.f32 %v101_v42, %v101_v42 }
  0xa1   :  { %176 = vmatmul.f32.gmra.mxu1 %v128_v43 }
  0xa6   :  { %v103_v44 = vpop.f32.mrf.mxu0 }
  0xa7   :  { %v129_v45 = vmul.f32 %v103_v44, %v103_v44 }
  0xa9   :  { %179 = vmatmul.f32.gmra.mxu1 %v129_v45 }
  0xae   :  { %v106_v46 = vpop.f32.mrf.mxu0 }
  0xaf   :  { %v130_v47 = vmul.f32 %v106_v46, %v106_v46 }
  0xb1   :  { %182 = vmatmul.f32.gmra.mxu1 %v130_v47 }
  0xb6   :  { %v108_v48 = vpop.f32.mrf.mxu0 }
  0xb7   :  { %v131_v49 = vmul.f32 %v108_v48, %v108_v48 }
  0xb9   :  { %185 = vmatmul.f32.gmra.mxu1 %v131_v49 }
  0xbe   :  { %v111_v50 = vpop.f32.mrf.mxu0 }
  0xbf   :  { %v132_v51 = vmul.f32 %v111_v50, %v111_v50 }
  0xc1   :  { %188 = vmatmul.f32.gmra.mxu1 %v132_v51 }
  0xc6   :  { %v113_v52 = vpop.f32.mrf.mxu0 }
  0xc7   :  { %v133_v53 = vmul.f32 %v113_v52, %v113_v52 }
  0xc9   :  { %191 = vmatmul.f32.vlgmr.msra.gmra.mxu3 %v133_v53 }
  0xce   :  { %v116_v54 = vpop.f32.mrf.mxu0 }
  0xcf   :  { %v134_v55 = vmul.f32 %v116_v54, %v116_v54 }
  0xd1   :  { %194 = vmatmul.f32.gmra.mxu3 %v134_v55 }
  0xd6   :  { %v118_v56 = vpop.f32.mrf.mxu0 }
  0xd7   :  { %v135_v57 = vmul.f32 %v118_v56, %v118_v56 }
  0xd9   :  { %197 = vmatmul.f32.gmra.mxu3 %v135_v57 }
  0xde   :  { %v121_v58 = vpop.f32.mrf.mxu0 }
  0xdf   :  { %v136_v59 = vmul.f32 %v121_v58, %v121_v58 }
  0xe1   :  { %200 = vmatmul.f32.gmra.mxu3 %v136_v59 }
  0xe6   :  { %v123_v60 = vpop.f32.mrf.mxu0 }
  0xe7   :  { %v137_v61 = vmul.f32 %v123_v60, %v123_v60  ;;  %v530_v60 = vmov -inf  }
  0xe8   :  { %368 = vmax.xlane.f32.xlu2 %v530_v60 }
  0xe9   :  { %203 = vmatmul.f32.gmra.mxu3 %v137_v61 }
 0x10e   :  { %v171_v0 = vpop.f32.mrf.mxu1 }
 0x10f   :  { %v217_v1 = vsel %vm213_vm1, %v171_v0, 0.0  ;;  %v223_v2 = vmax.f32 %v171_v0, 0.0 }
 0x111   :  { %506 = vrsqrt.f32 %v223_v2  ;;  %vm236_vm5 = vcmp.eq.f32.partialorder %v223_v2, inf  ;;  %v239_v20 = vand.u32 2147483648, %v223_v2  ;;  %vm238_vm6 = vcmp.eq.f32.partialorder %v223_v2, 0.0 }
 0x116   :  { %v174_v3 = vpop.f32.mrf.mxu1 }
 0x117   :  { %v507_v4 = vpop.eup %506  ;;  %v218_v5 = vsel %vm213_vm1, %v174_v3, 0.0  ;;  %v224_v6 = vmax.f32 %v174_v3, 0.0 }
 0x118   :  { %v230_v7 = vmul.f32 %v507_v4, %v223_v2 }
 0x119   :  { %508 = vrsqrt.f32 %v224_v6  ;;  %vm248_vm7 = vcmp.eq.f32.partialorder %v224_v6, inf  ;;  %v251_v35 = vand.u32 2147483648, %v224_v6  ;;  %vm250_vm8 = vcmp.eq.f32.partialorder %v224_v6, 0.0 }
 0x11a   :  { %v231_v8 = vmul.f32 %v507_v4, %v230_v7 }
 0x11c   :  { %v232_v9 = vmul.f32 0.5, %v231_v8 }
 0x11e   :  { %v177_v10 = vpop.f32.mrf.mxu1  ;;  %v233_v11 = vsub.f32 1.5, %v232_v9 }
 0x11f   :  { %v509_v12 = vpop.eup %508  ;;  %v219_v13 = vsel %vm213_vm1, %v177_v10, 0.0  ;;  %v225_v14 = vmax.f32 %v177_v10, 0.0 }
 0x120   :  { %v234_v15 = vmul.f32 %v507_v4, %v233_v11  ;;  %v242_v16 = vmul.f32 %v509_v12, %v224_v6 }
 0x121   :  { %510 = vrsqrt.f32 %v225_v14  ;;  %vm260_vm9 = vcmp.eq.f32.partialorder %v225_v14, inf  ;;  %v263_v50 = vand.u32 2147483648, %v225_v14  ;;  %vm262_vm10 = vcmp.eq.f32.partialorder %v225_v14, 0.0 }
 0x122   :  { %v235_v17 = vmul.f32 %v234_v15, %v223_v2  ;;  %v243_v18 = vmul.f32 %v509_v12, %v242_v16 }
 0x124   :  { %v237_v21 = vsel %vm236_vm5, %v223_v2, %v235_v17  ;;  %v244_v22 = vmul.f32 0.5, %v243_v18 }
 0x125   :  { %v240_v23 = vsel %vm238_vm6, %v239_v20, %v237_v21 }
 0x126   :  { %v180_v24 = vpop.f32.mrf.mxu1  ;;  %v301_v25 = vsel %vm670_vm4, %v240_v23, 0.0  ;;  %v245_v26 = vsub.f32 1.5, %v244_v22 }
 0x127   :  { %v511_v27 = vpop.eup %510  ;;  %v220_v28 = vsel %vm213_vm1, %v180_v24, 0.0  ;;  %v226_v29 = vmax.f32 %v180_v24, 0.0  ;;  %v678_v30 = vadd.f32 %v301_v25, %v217_v1 }
 0x128   :  { %v246_v31 = vmul.f32 %v509_v12, %v245_v26  ;;  %v254_v32 = vmul.f32 %v511_v27, %v225_v14 }
 0x129   :  { %512 = vrsqrt.f32 %v226_v29  ;;  %vm272_vm11 = vcmp.eq.f32.partialorder %v226_v29, inf  ;;  %v275_v4 = vand.u32 2147483648, %v226_v29  ;;  %vm274_vm12 = vcmp.eq.f32.partialorder %v226_v29, 0.0 }
 0x12a   :  { %v247_v33 = vmul.f32 %v246_v31, %v224_v6  ;;  %v255_v34 = vmul.f32 %v511_v27, %v254_v32 }
 0x12c   :  { %v249_v36 = vsel %vm248_vm7, %v224_v6, %v247_v33  ;;  %v256_v37 = vmul.f32 0.5, %v255_v34 }
 0x12d   :  { %v252_v38 = vsel %vm250_vm8, %v251_v35, %v249_v36 }
 0x12e   :  { %v183_v39 = vpop.f32.mrf.mxu1  ;;  %v302_v40 = vsel %vm670_vm4, %v252_v38, 0.0  ;;  %v257_v41 = vsub.f32 1.5, %v256_v37 }
 0x12f   :  { %v513_v42 = vpop.eup %512  ;;  %v221_v43 = vsel %vm213_vm1, %v183_v39, 0.0  ;;  %v227_v44 = vmax.f32 %v183_v39, 0.0  ;;  %v684_v45 = vadd.f32 %v302_v40, %v218_v5  ;;  %v210_v39 = vshrl.u32 %v207_v62, 7 }
 0x130   :  { %v258_v46 = vmul.f32 %v511_v27, %v257_v41  ;;  %v266_v47 = vmul.f32 %v513_v42, %v226_v29 }
 0x131   :  { %514 = vrsqrt.f32 %v227_v44  ;;  %vm284_vm13 = vcmp.eq.f32.partialorder %v227_v44, inf  ;;  %v287_v18 = vand.u32 2147483648, %v227_v44  ;;  %vm286_vm14 = vcmp.eq.f32.partialorder %v227_v44, 0.0 }
 0x132   :  { %v259_v48 = vmul.f32 %v258_v46, %v225_v14  ;;  %v267_v49 = vmul.f32 %v513_v42, %v266_v47 }
 0x134   :  { %v261_v51 = vsel %vm260_vm9, %v225_v14, %v259_v48  ;;  %v268_v52 = vmul.f32 0.5, %v267_v49 }
 0x135   :  { %v264_v53 = vsel %vm262_vm10, %v263_v50, %v261_v51 }
 0x136   :  { %v186_v54 = vpop.f32.mrf.mxu1  ;;  %v303_v55 = vsel %vm670_vm4, %v264_v53, 0.0  ;;  %v269_v56 = vsub.f32 1.5, %v268_v52 }
 0x137   :  { %v515_v57 = vpop.eup %514  ;;  %v222_v58 = vsel %vm213_vm1, %v186_v54, 0.0  ;;  %v228_v59 = vmax.f32 %v186_v54, 0.0  ;;  %v690_v61 = vadd.f32 %v303_v55, %v219_v13  ;;  %vm702_vm1 = vmand %vm343_vm15, %vm344_vm0 }
 0x138   :  { %v270_v0 = vmul.f32 %v513_v42, %v269_v56  ;;  %v278_v1 = vmul.f32 %v515_v57, %v227_v44  ;;  %v211_v42 = vadd.s32 8, %v210_v39 }
 0x139   :  { %516 = vrsqrt.f32 %v228_v59  ;;  %vm296_vm2 = vcmp.eq.f32.partialorder %v228_v59, inf  ;;  %v299_v33 = vand.u32 2147483648, %v228_v59  ;;  %vm298_vm3 = vcmp.eq.f32.partialorder %v228_v59, 0.0 }
 0x13a   :  { %v271_v2 = vmul.f32 %v270_v0, %v226_v29  ;;  %v279_v3 = vmul.f32 %v515_v57, %v278_v1  ;;  %vm347_vm5 = vcmp.lt.s32.totalorder %v211_v42, 13 }
 0x13b   :  { %vm720_vm6 = vmand %vm702_vm1, %vm347_vm5 }
 0x13c   :  { %v273_v5 = vsel %vm272_vm11, %v226_v29, %v271_v2  ;;  %v280_v6 = vmul.f32 0.5, %v279_v3  ;;  %v409_v2 = vld [vmem:[%s819_s3 + $0x78] sm:$0xff]  ;;  %v408_v3 = vld [vmem:[%s819_s3 + $0x70] sm:$0xff] }
 0x13d   :  { %v276_v7 = vsel %vm274_vm12, %v275_v4, %v273_v5  ;;  %410 = vmatpush.msra.mxu2 %v409_v2  ;;  %v407_v4 = vld [vmem:[%s819_s3 + $0x68] sm:$0xff]  ;;  %v406_v5 = vld [vmem:[%s819_s3 + $0x60] sm:$0xff] }
 0x13e   :  { %v189_v8 = vpop.f32.mrf.mxu1  ;;  %v304_v9 = vsel %vm670_vm4, %v276_v7, 0.0  ;;  %v281_v10 = vsub.f32 1.5, %v280_v6  ;;  %v405_v6 = vld [vmem:[%s819_s3 + $0x58] sm:$0xff]  ;;  %v404_v7 = vld [vmem:[%s819_s3 + $0x50] sm:$0xff] }
 0x13f   :  { %v517_v11 = vpop.eup %516  ;;  %v313_v12 = vmax.f32 %v189_v8, 1e-10  ;;  %v694_v13 = vadd.f32 %v304_v9, %v220_v28  ;;  %411 = vmatpush.msra.mxu2 %v408_v3  ;;  %v403_v8 = vld [vmem:[%s819_s3 + $0x48] sm:$0xff]  ;;  %v402_v9 = vld [vmem:[%s819_s3 + $0x40] sm:$0xff] }
 0x140   :  { %v282_v14 = vmul.f32 %v515_v57, %v281_v10  ;;  %v290_v15 = vmul.f32 %v517_v11, %v228_v59  ;;  %v401_v10 = vld [vmem:[%s819_s3 + $0x38] sm:$0xff] }
 0x141   :  { %518 = vlog2.f32 %v313_v12  ;;  %412 = vmatpush.msra.mxu2 %v407_v4  ;;  %v399_v12 = vld [vmem:[%s819_s3 + $0x28] sm:$0xff] }
 0x142   :  { %v283_v16 = vmul.f32 %v282_v14, %v227_v44  ;;  %v291_v17 = vmul.f32 %v517_v11, %v290_v15  ;;  %v398_v14 = vld [vmem:[%s819_s3 + $0x20] sm:$0xff]  ;;  %v397_v15 = vld [vmem:[%s819_s3 + $0x18] sm:$0xff] }
 0x143   :  { %413 = vmatpush.msra.mxu2 %v406_v5 }
 0x144   :  { %v285_v20 = vsel %vm284_vm13, %v227_v44, %v283_v16  ;;  %v292_v21 = vmul.f32 0.5, %v291_v17  ;;  %v396_v16 = vld [vmem:[%s819_s3 + $0x10] sm:$0xff]  ;;  %v395_v17 = vld [vmem:[%s819_s3 + $0x8] sm:$0xff] }
 0x145   :  { %v288_v22 = vsel %vm286_vm14, %v287_v18, %v285_v20  ;;  %414 = vmatpush.msra.mxu2 %v405_v6  ;;  %v394_v18 = vld [vmem:[%s819_s3] sm:$0xff] }
 0x146   :  { %v305_v23 = vsel %vm670_vm4, %v288_v22, 0.0  ;;  %v293_v24 = vsub.f32 1.5, %v292_v21 }
 0x147   :  { %v519_v25 = vpop.eup %518  ;;  %v698_v26 = vadd.f32 %v305_v23, %v221_v43  ;;  %415 = vmatpush.msra.mxu2 %v404_v7 }
 0x148   :  { %v320_v27 = vmul.f32 0.6931472, %v519_v25  ;;  %v294_v28 = vmul.f32 %v517_v11, %v293_v24  ;;  %v400_v11 = vld [vmem:[%s819_s3 + $0x30] sm:$0xff] }
 0x149   :  { %416 = vmatpush.msra.mxu2 %v403_v8 }
 0x14a   :  { %v331_v29 = vmul.f32 0.4342945, %v320_v27  ;;  %v295_v31 = vmul.f32 %v294_v28, %v228_v59 }
 0x14b   :  { %417 = vmatpush.msra.mxu2 %v402_v9 }
 0x14c   :  { %v192_v34 = vpop.f32.mrf.mxu3  ;;  %v706_v35 = vmul.f32 10.0, %v331_v29  ;;  %v297_v36 = vsel %vm296_vm2, %v228_v59, %v295_v31 }
 0x14d   :  { %v314_v37 = vmax.f32 %v192_v34, 1e-10  ;;  %v300_v38 = vsel %vm298_vm3, %v299_v33, %v297_v36  ;;  %418 = vmatpush.msra.mxu2 %v401_v10 }
 0x14e   :  { %v352_v63 = vsel %vm702_vm1, %v706_v35, -inf  ;;  %v306_v40 = vsel %vm670_vm4, %v300_v38, 0.0 }
 0x14f   :  { %520 = vlog2.f32 %v314_v37  ;;  %358 = vmax.xlane.f32.xlu0 %v352_v63  ;;  %v714_v41 = vadd.f32 %v306_v40, %v222_v58  ;;  %419 = vmatpush.msra.mxu2 %v400_v11 }
 0x151   :  { %420 = vmatpush.msra.mxu2 %v399_v12 }
 0x153   :  { %421 = vmatpush.msra.mxu2 %v398_v14 }
 0x154   :  { %v716_v43 = vpop.f32.mrf.mxu3 }
 0x155   :  { %v521_v44 = vpop.eup %520  ;;  %422 = vmatpush.msra.mxu2 %v397_v15  ;;  %v315_v31 = vmax.f32 %v716_v43, 1e-10 }
 0x156   :  { %v322_v46 = vmul.f32 0.6931472, %v521_v44 }
 0x157   :  { %362 = vmax.xlane.f32.xlu0 %v530_v60  ;;  %423 = vmatpush.msra.mxu2 %v396_v16 }
 0x158   :  { %v332_v47 = vmul.f32 0.4342945, %v322_v46 }
 0x159   :  { %424 = vmatpush.msra.mxu2 %v395_v17 }
 0x15a   :  { %v724_v62 = vmul.f32 10.0, %v332_v47 }
 0x15b   :  { %425 = vmatpush.msra.mxu2 %v394_v18  ;;  %v369_v34 = vpop.xlane.xlu2 %368 }
 0x15c   :  { %v198_v19 = vpop.f32.mrf.mxu3  ;;  %v353_v49 = vsel %vm720_vm6, %v724_v62, -inf }
 0x15d   :  { %v316_v50 = vmax.f32 %v198_v19, 1e-10  ;;  %360 = vmax.xlane.f32.xlu1 %v353_v49 }
 0x15f   :  { %522 = vlog2.f32 %v316_v50 }
 0x164   :  { %v201_v51 = vpop.f32.mrf.mxu3 }
 0x165   :  { %v523_v52 = vpop.eup %522  ;;  %v317_v53 = vmax.f32 %v201_v51, 1e-10 }
 0x166   :  { %v326_v54 = vmul.f32 0.6931472, %v523_v52 }
 0x167   :  { %524 = vlog2.f32 %v317_v53 }
 0x168   :  { %v334_v55 = vmul.f32 0.4342945, %v326_v54  ;;  %526 = vlog2.f32 %v315_v31 }
 0x16a   :  { %v729_v56 = vmul.f32 10.0, %v334_v55 }
 0x16c   :  { %v355_v57 = vsel %vm702_vm1, %v729_v56, -inf  ;;  %v204_v19 = vpop.f32.mrf.mxu3 }
 0x16d   :  { %v525_v58 = vpop.eup %524  ;;  %364 = vmax.xlane.f32.xlu1 %v355_v57  ;;  %v318_v53 = vmax.f32 %v204_v19, 1e-10 }
 0x16e   :  { %v328_v59 = vmul.f32 0.6931472, %v525_v58  ;;  %v527_v38 = vpop.eup %526 }
 0x16f   :  { %v324_v39 = vmul.f32 0.6931472, %v527_v38  ;;  %528 = vlog2.f32 %v318_v53 }
 0x170   :  { %v335_v60 = vmul.f32 0.4342945, %v328_v59 }
 0x171   :  { %v333_v47 = vmul.f32 0.4342945, %v324_v39 }
 0x172   :  { %v734_v0 = vmul.f32 10.0, %v335_v60 }
 0x173   :  { %v339_v50 = vmul.f32 10.0, %v333_v47 }
 0x174   :  { %v356_v1 = vsel %vm720_vm6, %v734_v0, -inf }
 0x175   :  { %366 = vmax.xlane.f32.xlu2 %v356_v1  ;;  %v529_v58 = vpop.eup %528 }
 0x1c2   :  { %v359_v20 = vpop.xlane.xlu0 %358 }
 0x1ca   :  { %v363_v21 = vpop.xlane.xlu0 %362 }
 0x1cb   :  { %v370_v22 = vmax.f32 %v359_v20, %v363_v21 }
 0x1d0   :  { %v361_v23 = vpop.xlane.xlu1 %360 }
 0x1d1   :  { %v371_v24 = vmax.f32 %v370_v22, %v361_v23 }
 0x1d3   :  { %v372_v25 = vrot.slane %v371_v24, 4 }
 0x1d5   :  { %v373_v27 = vmax.f32 %v371_v24, %v372_v25 }
 0x1d7   :  { %v374_v28 = vrot.slane %v373_v27, 2 }
 0x1d9   :  { %v375_v29 = vmax.f32 %v373_v27, %v374_v28 }
 0x1db   :  { %v376_v32 = vrot.slane %v375_v29, 1 }
 0x1dd   :  { %v377_v33 = vmax.f32 %v375_v29, %v376_v32 }
 0x1df   :  { %v483_v36 = vadd.f32 -80.0, %v377_v33 }
 0x1e0   :  { %v365_v63 = vpop.xlane.xlu1 %364 }
 0x1e1   :  { %v388_v37 = vmax.f32 %v706_v35, %v483_v36  ;;  %v378_v40 = vmax.f32 %v365_v63, %v369_v34  ;;  %v389_v46 = vmax.f32 %v724_v62, %v483_v36  ;;  %v390_v52 = vmax.f32 %v339_v50, %v483_v36 }
 0x1e2   :  { %v330_v62 = vmul.f32 0.6931472, %v529_v58 }
 0x1e3   :  { %426 = vmatmul.f32.vlgmr.msra.gmra.mxu2 %v388_v37 }
 0x1e4   :  { %v336_v60 = vmul.f32 0.4342945, %v330_v62 }
 0x1e6   :  { %v342_v1 = vmul.f32 10.0, %v336_v60 }
 0x1e8   :  { %v367_v42 = vpop.xlane.xlu2 %366 }
 0x1e9   :  { %v379_v44 = vmax.f32 %v378_v40, %v367_v42 }
 0x1eb   :  { %v380_v48 = vrot.slane %v379_v44, 4  ;;  %429 = vmatmul.f32.gmra.mxu2 %v389_v46 }
 0x1ed   :  { %v381_v43 = vmax.f32 %v379_v44, %v380_v48 }
 0x1ef   :  { %v382_v49 = vrot.slane %v381_v43, 2 }
 0x1f1   :  { %v383_v51 = vmax.f32 %v381_v43, %v382_v49 }
 0x1f3   :  { %v384_v35 = vrot.slane %v383_v51, 1  ;;  %432 = vmatmul.f32.gmra.mxu2 %v390_v52 }
 0x1f5   :  { %v385_v54 = vmax.f32 %v383_v51, %v384_v35 }
 0x1f7   :  { %v484_v55 = vadd.f32 -80.0, %v385_v54 }
 0x1f9   :  { %v391_v57 = vmax.f32 %v729_v56, %v484_v55  ;;  %v392_v59 = vmax.f32 %v734_v0, %v484_v55  ;;  %v393_v2 = vmax.f32 %v342_v1, %v484_v55 }
 0x1fb   :  { %435 = vmatmul.f32.gmra.mxu2 %v391_v57 }
 0x203   :  { %438 = vmatmul.f32.gmra.mxu2 %v392_v59 }
 0x20b   :  { %441 = vmatmul.f32.gmra.mxu2 %v393_v2 }
 0x266   :  { %v427_v3 = vpop.f32.mrf.mxu2 }
 0x267   :  { %v445_v4 = vadd.f32 %v427_v3, %v678_v30 }
 0x269   :  { %451 = vst [vmem:[%s820_s4] sm:$0xff] %v445_v4 }
 0x26e   :  { %v430_v5 = vpop.f32.mrf.mxu2 }
 0x26f   :  { %v446_v56 = vadd.f32 %v430_v5, %v684_v45 }
 0x271   :  { %452 = vst [vmem:[%s820_s4 + $0x8] sm:$0xff] %v446_v56 }
 0x276   :  { %v433_v0 = vpop.f32.mrf.mxu2 }
 0x277   :  { %v447_v6 = vadd.f32 %v433_v0, %v690_v61 }
 0x279   :  { %453 = vst [vmem:[%s820_s4 + $0x10] sm:$0xff] %v447_v6 }
 0x27e   :  { %v436_v7 = vpop.f32.mrf.mxu2 }
 0x27f   :  { %v448_v30 = vadd.f32 %v436_v7, %v694_v13 }
 0x281   :  { %454 = vst [vmem:[%s820_s4 + $0x18] sm:$0xff] %v448_v30 }
 0x286   :  { %v439_v8 = vpop.f32.mrf.mxu2 }
 0x287   :  { %v449_v45 = vadd.f32 %v439_v8, %v698_v26 }
 0x289   :  { %455 = vst [vmem:[%s820_s4 + $0x20] sm:$0xff] %v449_v45 }
 0x28e   :  { %v442_v9 = vpop.f32.mrf.mxu2 }
 0x28f   :  { %v450_v61 = vadd.f32 %v442_v9, %v714_v41 }
 0x291   :  { %456 = vst [vmem:[%s820_s4 + $0x28] sm:$0xff] %v450_v61 }

</bundles_post_ra>
